<compile_context>
chip_gen: v7x
topology: tpu7x:2x2x1
jax: 0.10.0
libtpu: 0.0.40
codegen_flags: <defaults>
</compile_context>

<pallas_src>
import dataclasses
import functools

import jax
import jax.numpy as jnp
from jax.experimental import pallas as pl
from jax.experimental.pallas import tpu as pltpu


def _round_up(x, m):
    return ((x + m - 1) // m) * m


# -----------------------------------------------------------------------------
# Path (a): fused one-hot gather + DistMult score + sum over embedding dim
# -----------------------------------------------------------------------------
def _distmult_onehot_kernel(idx_ref, e_t_ref, rel_t_ref, out_ref):
    """out[0, t] = sum_d E[s[t], d] * R[r[t], d] * E[o[t], d].

    idx_ref   : (3, tile_t) int32  rows = (s, r, o) indices for this tile (lanes).
    e_t_ref   : (d, n_ent_pad)     transposed entity table (VMEM-resident, 1 buffer).
    rel_t_ref : (d, n_rel_pad)     transposed relation table.
    out_ref   : (1, tile_t) f32    lane-dense scores.
    """
    tile_t = out_ref.shape[1]
    tdtype = e_t_ref.dtype
    n_ent_p = e_t_ref.shape[1]
    n_rel_p = rel_t_ref.shape[1]

    idx = idx_ref[...]                                               # (3, tile_t) int32

    # Fused s/o entity gather: one iota, one int32 compare, one bool->dtype cast,
    # ONE matmul against the shared entity-table LHS (columns [0:tile) are s,
    # [tile:2*tile) are o).  Exact: one-hot * bf16 row with f32 accumulation.
    so_idx = jnp.concatenate([idx[0:1, :], idx[2:3, :]], axis=1)     # (1, 2*tile_t)
    ent_rows = jax.lax.broadcasted_iota(jnp.int32, (n_ent_p, 2 * tile_t), 0)
    onehot_so = (ent_rows == so_idx).astype(tdtype)                  # (n_ent_p, 2*tile_t)
    so = jnp.dot(e_t_ref[...], onehot_so, preferred_element_type=jnp.float32)
    s = so[:, :tile_t]                                               # (d, tile_t) f32
    o = so[:, tile_t:]

    rel_rows = jax.lax.broadcasted_iota(jnp.int32, (n_rel_p, tile_t), 0)
    onehot_r = (rel_rows == idx[1:2, :]).astype(tdtype)
    r = jnp.dot(rel_t_ref[...], onehot_r, preferred_element_type=jnp.float32)

    # VPU product + sublane reduce -> lane-dense (1, tile_t) store.
    # TODO(synk): if vst pressure ever shows in the bundle dump, emit (8, tile/8) blocks.
    out_ref[...] = jnp.sum(s * r * o, axis=0, keepdims=True)


@functools.partial(jax.jit, static_argnames=("tile_t",))
def _score_sum_onehot(e_t, rel_t, triplets, *, tile_t=512):
    t = triplets.shape[0]
    d, n_ent_p = e_t.shape
    _, n_rel_p = rel_t.shape
    itemsize = e_t.dtype.itemsize

    # Triplet tiling: lanes want multiples of 128; big tiles amortize the ~0.35us/step
    # overhead (sweep tile_t per generation: v5e/v7x smaller, v6e can afford 1024).
    t128 = _round_up(t, 128)
    tile = max(128, (min(int(tile_t), t128) // 128) * 128)
    if t128 >= 256:
        # v7x megacore: guarantee >= 2 grid steps so both TensorCores get work.
        tile = min(tile, max(128, ((t128 // 2) // 128) * 128))
    t_pad = _round_up(t, tile)
    grid = (t_pad // tile,)

    # Single packed (3, t_pad) index array -> one small DMA per grid step.
    idx = jnp.pad(triplets.astype(jnp.int32), ((0, t_pad - t), (0, 0))).T

    # Explicit scoped-VMEM budget: single-buffered tables + double-buffered idx/out
    # streams + in-kernel one-hot intermediates, with headroom.
    tables_bytes = (n_ent_p + n_rel_p) * d * itemsize
    stream_bytes = 2 * tile * (3 * 4 + 4)
    interm_bytes = (n_ent_p * 2 * tile + n_rel_p * tile) * (4 + itemsize) + 3 * d * tile * 4
    vmem_limit = int(min(max(32 << 20, 2 * (tables_bytes + stream_bytes + interm_bytes)),
                         64 << 20))

    cost = pl.CostEstimate(
        flops=2 * d * (2 * n_ent_p + n_rel_p) * t_pad + 3 * d * t_pad,
        transcendentals=0,
        bytes_accessed=(3 * 4 + 4) * t_pad + tables_bytes,
    )

    scores = pl.pallas_call(
        _distmult_onehot_kernel,
        out_shape=jax.ShapeDtypeStruct((1, t_pad), jnp.float32),
        grid=grid,
        in_specs=[
            pl.BlockSpec((3, tile), lambda i: (0, i)),
            # Constant block index across the grid -> single-buffer the tables.
            pl.BlockSpec((d, n_ent_p), lambda i: (0, 0), pipeline_mode=pl.Buffered(1)),
            pl.BlockSpec((d, n_rel_p), lambda i: (0, 0), pipeline_mode=pl.Buffered(1)),
        ],
        out_specs=pl.BlockSpec((1, tile), lambda i: (0, i)),
        compiler_params=pltpu.CompilerParams(
            dimension_semantics=("parallel",),
            vmem_limit_bytes=vmem_limit,
        ),
        cost_estimate=cost,
    )(idx, e_t, rel_t)
    # Padded tail lanes gathered row 0 and hold garbage; they are sliced off here and
    # must be masked by any future fused consumer of the padded output.
    return scores[0, :t]


# -----------------------------------------------------------------------------
# Path (b): scalar-prefetch DMA row-gather (tables stay in HBM; scales with n_ent)
# -----------------------------------------------------------------------------
def _distmult_gather_kernel(idx_ref, s_row_ref, r_row_ref, o_row_ref, out_ref):
    """One triplet per inner grid step; scores accumulate into a resident (1, tile_g)
    output block (lane j of the block = triplet j of the tile)."""
    del idx_ref  # consumed by the index_maps only
    j = pl.program_id(1)

    @pl.when(j == 0)
    def _():
        out_ref[...] = jnp.zeros_like(out_ref)

    prod = (s_row_ref[...].astype(jnp.float32)
            * r_row_ref[...].astype(jnp.float32)
            * o_row_ref[...].astype(jnp.float32))                   # (1, 1, d)
    score = jnp.sum(prod, axis=-1)                                  # (1, 1)
    lane = jax.lax.broadcasted_iota(jnp.int32, out_ref.shape, 1)    # (1, tile_g)
    out_ref[...] += jnp.where(lane == j, score, 0.0)


@functools.partial(jax.jit, static_argnames=("tile_g",))
def _score_sum_gather(ent3, rel3, triplets, *, tile_g=128):
    t = triplets.shape[0]
    d = ent3.shape[-1]
    t_pad = _round_up(t, tile_g)
    n_tiles = t_pad // tile_g

    idx = jnp.pad(triplets.astype(jnp.int32), ((0, t_pad - t), (0, 0))).T   # (3, t_pad)

    def s_map(i, j, idx_ref):
        return (idx_ref[0, i * tile_g + j], 0, 0)

    def r_map(i, j, idx_ref):
        return (idx_ref[1, i * tile_g + j], 0, 0)

    def o_map(i, j, idx_ref):
        return (idx_ref[2, i * tile_g + j], 0, 0)

    grid_spec = pltpu.PrefetchScalarGridSpec(
        num_scalar_prefetch=1,
        grid=(n_tiles, tile_g),
        in_specs=[
            pl.BlockSpec((1, 1, d), s_map),     # one entity row per step, DMA'd by Pallas
            pl.BlockSpec((1, 1, d), r_map),     # one relation row per step
            pl.BlockSpec((1, 1, d), o_map),     # one entity row per step
        ],
        out_specs=pl.BlockSpec((1, tile_g), lambda i, j, idx_ref: (0, i)),
    )

    scores = pl.pallas_call(
        _distmult_gather_kernel,
        out_shape=jax.ShapeDtypeStruct((1, t_pad), jnp.float32),
        grid_spec=grid_spec,
        compiler_params=pltpu.CompilerParams(
            dimension_semantics=("parallel", "arbitrary")),
    )(idx, ent3, rel3, ent3)
    return scores[0, :t]


# -----------------------------------------------------------------------------
# Table preparation (done ONCE, outside the jitted scoring calls) & dispatch
# -----------------------------------------------------------------------------
@dataclasses.dataclass(frozen=True)
class ScoreTables:
    mode: str        # "onehot" | "gather"
    ent: jax.Array   # onehot: (d, n_ent_pad) transposed+padded; gather: (n_ent, 1, d)
    rel: jax.Array   # onehot: (d, n_rel_pad);                    gather: (n_rel, 1, d)


def prepare_tables(embedding, emb_rel, *, onehot_max_rows=1024):
    """Lay the parameter tables out for the scoring kernels.  Call once and reuse:
    this is where the transpose/pad HBM traffic happens (hoisted out of the jit)."""
    n_ent, d = embedding.shape
    n_rel = emb_rel.shape[0]
    n_ent_p = _round_up(n_ent, 128)
    n_rel_p = _round_up(n_rel, 128)
    if n_ent_p <= onehot_max_rows and n_rel_p <= onehot_max_rows:
        e_t = jnp.pad(embedding.T, ((0, 0), (0, n_ent_p - n_ent)))
        r_t = jnp.pad(emb_rel.T, ((0, 0), (0, n_rel_p - n_rel)))
        return ScoreTables("onehot", e_t, r_t)
    # Large tables: keep natural row-major layout in HBM for the DMA-gather path.
    return ScoreTables("gather", embedding.reshape(n_ent, 1, d),
                       emb_rel.reshape(n_rel, 1, d))


def distmult_forward(emb_e, h=None, g=None, r=None, norm=None):
    """DistMult.forward(h, g, r, norm) returns the entity embedding table (identity;
    the old copy kernel was a pure HBM round trip and stays deleted)."""
    return emb_e


def distmult_get_score(embedding, emb_rel, triplets):
    """Per-dimension scores E[s]*R[r]*E[o] in float32 (plain-JAX glue / reference)."""
    s = embedding[triplets[:, 0]].astype(jnp.float32)
    r = emb_rel[triplets[:, 1]].astype(jnp.float32)
    o = embedding[triplets[:, 2]].astype(jnp.float32)
    return s * r * o


def distmult_score_sum(tables, triplets, *, tile_t=512, tile_g=128):
    """sum(get_score(triplets, E), dim=1) -> (T,) float32 logits via Pallas."""
    if tables.mode == "onehot":
        return _score_sum_onehot(tables.ent, tables.rel, triplets, tile_t=tile_t)
    return _score_sum_gather(tables.ent, tables.rel, triplets, tile_g=tile_g)


def score_loss(tables, triplets, target):
    """F.binary_cross_entropy_with_logits(sum(score, dim=1), target)."""
    logits = distmult_score_sum(tables, triplets)
    target = target.astype(jnp.float32)
    loss = jnp.maximum(logits, 0.0) - logits * target + jnp.log1p(jnp.exp(-jnp.abs(logits)))
    return jnp.mean(loss)


def reg_loss(embedding, emb_rel):
    # Matches the PyTorch reference verbatim: mean(E) + mean(R**2).
    # NOTE: the entity term is not squared in the original source (likely a bug there);
    # reproduced as-is.
    return jnp.mean(embedding.astype(jnp.float32)) + jnp.mean(emb_rel.astype(jnp.float32) ** 2)


# -----------------------------------------------------------------------------
# Deterministic parameter init (mirrors DistMult.init()), bf16 storage
# -----------------------------------------------------------------------------
def init_params(key, num_entities, num_relations, embedding_dim, dtype=jnp.bfloat16):
    k_e, k_r = jax.random.split(key)
    # xavier_normal_(emb_e): std = sqrt(2 / (fan_in + fan_out))
    std_e = jnp.sqrt(2.0 / (num_entities + embedding_dim))
    emb_e = std_e * jax.random.normal(k_e, (num_entities, embedding_dim), jnp.float32)
    # xavier_uniform_(emb_rel, gain=calculate_gain('relu')=sqrt(2))
    gain = jnp.sqrt(2.0)
    bound = gain * jnp.sqrt(6.0 / (num_relations + embedding_dim))
    emb_rel = jax.random.uniform(
        k_r, (num_relations, embedding_dim), jnp.float32, minval=-bound, maxval=bound
    )
    # bf16 storage: both kernels gather bf16 rows exactly and accumulate in float32.
    return emb_e.astype(dtype), emb_rel.astype(dtype)


# -----------------------------------------------------------------------------
# Main
# -----------------------------------------------------------------------------
if __name__ == "__main__":
    key = jax.random.PRNGKey(0)

    num_entities = 40
    num_relations = 6
    embedding_dim = 32
    num_triplets = 16

    k_params, k_trip, k_tgt = jax.random.split(key, 3)
    emb_e, emb_rel = init_params(k_params, num_entities, num_relations, embedding_dim)

    k_s, k_r, k_o = jax.random.split(k_trip, 3)
    triplets = jnp.stack(
        [
            jax.random.randint(k_s, (num_triplets,), 0, num_entities),
            jax.random.randint(k_r, (num_triplets,), 0, num_relations),
            jax.random.randint(k_o, (num_triplets,), 0, num_entities),
        ],
        axis=1,
    ).astype(jnp.int32)
    target = jax.random.bernoulli(k_tgt, 0.5, (num_triplets,)).astype(jnp.float32)

    # forward(h, g, r, norm) -> emb_e (identity, no copy).
    embedding = distmult_forward(emb_e, None, None, None, None)
    assert embedding.shape == (num_entities, embedding_dim)

    # Plain-JAX reference (bf16 params upcast to f32, math in f32).
    ref_logits = jnp.sum(distmult_get_score(embedding, emb_rel, triplets), axis=1)

    # Path (a): VMEM-resident one-hot kernel (tables prepared once, reused).
    tables = prepare_tables(embedding, emb_rel)
    assert tables.mode == "onehot"
    logits = jax.block_until_ready(distmult_score_sum(tables, triplets))
    assert logits.shape == (num_triplets,)
    err = jnp.max(jnp.abs(logits - ref_logits))
    assert jnp.allclose(logits, ref_logits, atol=1e-5, rtol=1e-4), f"onehot mismatch: {err}"

    # Path (b): scalable scalar-prefetch DMA-gather kernel (forced via cutoff=0).
    tables_g = prepare_tables(embedding, emb_rel, onehot_max_rows=0)
    assert tables_g.mode == "gather"
    logits_g = jax.block_until_ready(distmult_score_sum(tables_g, triplets))
    err_g = jnp.max(jnp.abs(logits_g - ref_logits))
    assert jnp.allclose(logits_g, ref_logits, atol=1e-5, rtol=1e-4), f"gather mismatch: {err_g}"

    # Losses (glue around the fused scoring kernel).
    loss = jax.block_until_ready(score_loss(tables, triplets, target))
    reg = jax.block_until_ready(reg_loss(embedding, emb_rel))
    assert jnp.isfinite(loss) and jnp.isfinite(reg)

    print("KERNEL_OK")
</pallas_src>

<mosaic_0001>
module attributes {stable_mosaic.version = 11 : i64} {
  func.func @_distmult_onehot_kernel(%arg0: i32, %arg1: memref<3x128xi32, #tpu.memory_space<vmem>>, %arg2: memref<32x128xbf16, #tpu.memory_space<vmem>>, %arg3: memref<32x128xbf16, #tpu.memory_space<vmem>>, %arg4: memref<1x128xf32, #tpu.memory_space<vmem>>) attributes {dimension_semantics = [#tpu.dimension_semantics<parallel>], iteration_bounds = array<i64: 1>, scalar_prefetch = 0 : i64, scratch_operands = 0 : i64, tpu.core_type = #tpu.core_type<tc>, window_params = [{transform_indices = @transform_0, window_bounds = array<i64: 3, 128>}, {pipeline_mode = #tpu.pipeline_mode<synchronous>, transform_indices = @transform_1, window_bounds = array<i64: 32, 128>}, {pipeline_mode = #tpu.pipeline_mode<synchronous>, transform_indices = @transform_2, window_bounds = array<i64: 32, 128>}, {transform_indices = @transform_3, window_bounds = array<i64: 1, 128>}]} {
    %c0 = arith.constant 0 : index
    %c0_0 = arith.constant 0 : index
    %0 = vector.load %arg1[%c0, %c0_0] : memref<3x128xi32, #tpu.memory_space<vmem>>, vector<3x128xi32>
    %1 = vector.extract_strided_slice %0 {offsets = [0, 0], sizes = [1, 128], strides = [1, 1]} : vector<3x128xi32> to vector<1x128xi32>
    %2 = vector.extract_strided_slice %0 {offsets = [2, 0], sizes = [1, 128], strides = [1, 1]} : vector<3x128xi32> to vector<1x128xi32>
    %3 = tpu.concatenate %1, %2 in 1 : vector<1x128xi32>, vector<1x128xi32> -> vector<1x256xi32>
    %4 = tpu.iota {dimensions = array<i32: 0>} : vector<128x256xi32>
    %5 = vector.broadcast %3 : vector<1x256xi32> to vector<128x256xi32>
    %6 = arith.cmpi eq, %4, %5 : vector<128x256xi32>
    %7 = arith.extui %6 : vector<128x256xi1> to vector<128x256xi32>
    %8 = arith.sitofp %7 : vector<128x256xi32> to vector<128x256xf32>
    %9 = arith.truncf %8 : vector<128x256xf32> to vector<128x256xbf16>
    %c0_1 = arith.constant 0 : index
    %c0_2 = arith.constant 0 : index
    %10 = vector.load %arg2[%c0_1, %c0_2] : memref<32x128xbf16, #tpu.memory_space<vmem>>, vector<32x128xbf16>
    %cst = arith.constant dense<0.000000e+00> : vector<32x256xf32>
    %11 = tpu.matmul %10, %9, %cst {dimension_numbers = #tpu.dot_dimension_numbers<[1], [0], [0], [1], [0, 0, 1, 1], [], []>} : vector<32x128xbf16>, vector<128x256xbf16>, vector<32x256xf32> -> vector<32x256xf32>
    %12 = vector.extract_strided_slice %11 {offsets = [0, 0], sizes = [32, 128], strides = [1, 1]} : vector<32x256xf32> to vector<32x128xf32>
    %13 = vector.extract_strided_slice %11 {offsets = [0, 128], sizes = [32, 128], strides = [1, 1]} : vector<32x256xf32> to vector<32x128xf32>
    %14 = tpu.iota {dimensions = array<i32: 0>} : vector<128x128xi32>
    %15 = vector.extract_strided_slice %0 {offsets = [1, 0], sizes = [1, 128], strides = [1, 1]} : vector<3x128xi32> to vector<1x128xi32>
    %16 = vector.broadcast %15 : vector<1x128xi32> to vector<128x128xi32>
    %17 = arith.cmpi eq, %14, %16 : vector<128x128xi32>
    %18 = arith.extui %17 : vector<128x128xi1> to vector<128x128xi32>
    %19 = arith.sitofp %18 : vector<128x128xi32> to vector<128x128xf32>
    %20 = arith.truncf %19 : vector<128x128xf32> to vector<128x128xbf16>
    %c0_3 = arith.constant 0 : index
    %c0_4 = arith.constant 0 : index
    %21 = vector.load %arg3[%c0_3, %c0_4] : memref<32x128xbf16, #tpu.memory_space<vmem>>, vector<32x128xbf16>
    %cst_5 = arith.constant dense<0.000000e+00> : vector<32x128xf32>
    %22 = tpu.matmul %21, %20, %cst_5 {dimension_numbers = #tpu.dot_dimension_numbers<[1], [0], [0], [1], [0, 0, 1, 1], [], []>} : vector<32x128xbf16>, vector<128x128xbf16>, vector<32x128xf32> -> vector<32x128xf32>
    %23 = arith.mulf %12, %22 : vector<32x128xf32>
    %24 = arith.mulf %23, %13 : vector<32x128xf32>
    %cst_6 = arith.constant dense<0.000000e+00> : vector<128xf32>
    %25 = vector.multi_reduction <add>, %24, %cst_6 [0] : vector<32x128xf32> to vector<128xf32>
    %26 = vector.shape_cast %25 : vector<128xf32> to vector<1x128xf32>
    %c0_7 = arith.constant 0 : index
    %c0_8 = arith.constant 0 : index
    %27 = vector.load %arg4[%c0_7, %c0_8] : memref<1x128xf32, #tpu.memory_space<vmem>>, vector<1x128xf32>
    tpu.vector_store %arg4[%c0_7, %c0_8], %26 {strides = array<i32>} : memref<1x128xf32, #tpu.memory_space<vmem>>, vector<1x128xf32>,
    return
  }
  func.func @transform_0(%arg0: i32) -> (i32, i32) {
    %c0_i32 = arith.constant 0 : i32
    %c0_i32_0 = arith.constant 0 : i32
    return %c0_i32, %arg0 : i32, i32
  }
  func.func @transform_1(%arg0: i32) -> (i32, i32) {
    %c0_i32 = arith.constant 0 : i32
    %c0_i32_0 = arith.constant 0 : i32
    %c0_i32_1 = arith.constant 0 : i32
    return %c0_i32, %c0_i32_0 : i32, i32
  }
  func.func @transform_2(%arg0: i32) -> (i32, i32) {
    %c0_i32 = arith.constant 0 : i32
    %c0_i32_0 = arith.constant 0 : i32
    %c0_i32_1 = arith.constant 0 : i32
    return %c0_i32, %c0_i32_0 : i32, i32
  }
  func.func @transform_3(%arg0: i32) -> (i32, i32) {
    %c0_i32 = arith.constant 0 : i32
    %c0_i32_0 = arith.constant 0 : i32
    return %c0_i32, %arg0 : i32, i32
  }
}

</mosaic_0001>

<bundles_post_ra>
// kernel: _score_sum_onehot.1
= control target key start
LH: loop header
LB: loop body
LE: loop exit
PB: predicated region body
PF: predicated region fallthrough
CT: control target
= control target key end

     0   :  { %8 = vsyncpa [#allocation3], 0  ;;  %s790_s0 = inlined_call_operand.vmem [shape: s32[3,128], index: 0, kind: input, shape index: {}]   ;;  %s791_s1 = inlined_call_operand.hbm [shape: bf16[32,128], index: 1, kind: input, shape index: {}]   ;;  %s792_s2 = inlined_call_operand.hbm [shape: bf16[32,128], index: 2, kind: input, shape index: {}]   ;;  %s793_s3 = inlined_call_operand.vmem [shape: f32[1,128], index: 3, kind: output, shape index: {}]  }
   0x1   :  { %9 = vsyncpa [#allocation5], 0  ;;  %s588_s12 = smov [#allocation2]   ;;  %s540_s16 = scalar_lea.hbm %s791_s1, 256 }
   0x2   :  { %s17_s13 = sshll.u32 %s588_s12, 4  ;;  %p541_p0 = scmp.ne.s32.totalorder %s791_s1, %s540_s16  ;;  %s18_s13 = int_to_ptr.vmem [resolvable:$true] %s17_s13 }
   0x3   :  { %p544_p1 = scmp.lt.u32.totalorder %s540_s16, %s791_s1 }
   0x5   :  { %p546_p2 = pnand %p544_p1, %p541_p0 }
   0x7   :  { %549 = shalt.err (!%p546_p2)
}
   0x8   :  { %s550_s21 = scalar_lea.vmem %s18_s13, 256  ;;  %p555_p4 = scmp.lt.s32.totalorder %s18_s13, %s18_s13 }
   0x9   :  { %p551_p3 = scmp.ne.s32.totalorder %s18_s13, %s550_s21  ;;  %p556_p5 = scmp.lt.s32.totalorder %s550_s21, %s550_s21 }
   0xb   :  { %p557_p6 = por %p556_p5, %p555_p4 }
   0xd   :  { %p558_p7 = pnand %p557_p6, %p551_p3 }
   0xf   :  { %561 = shalt.err (!%p558_p7)
}
  0x10   :  { %s589_s22 = smov 64   ;;  %s590_s23 = smov 4  }
  0x11   :  { %23 = dma.hbm_to_vmem [thread:$0]  %s791_s1, 256, %s18_s13, [#allocation3], %s589_s22, %s589_s22, %s590_s23  }
  0x12   :  { %s591_s26 = smov [#allocation4]   ;;  %s562_s30 = scalar_lea.hbm %s792_s2, 256 }
  0x13   :  { %s29_s27 = sshll.u32 %s591_s26, 4  ;;  %p563_p8 = scmp.ne.s32.totalorder %s792_s2, %s562_s30  ;;  %s30_s27 = int_to_ptr.vmem [resolvable:$true] %s29_s27 }
  0x14   :  { %p566_p9 = scmp.lt.u32.totalorder %s562_s30, %s792_s2 }
  0x16   :  { %p568_p10 = pnand %p566_p9, %p563_p8 }
  0x18   :  { %571 = shalt.err (!%p568_p10)
}
  0x19   :  { %s572_s8 = scalar_lea.vmem %s30_s27, 256  ;;  %p577_p12 = scmp.lt.s32.totalorder %s30_s27, %s30_s27 }
  0x1a   :  { %p573_p11 = scmp.ne.s32.totalorder %s30_s27, %s572_s8  ;;  %p578_p13 = scmp.lt.s32.totalorder %s572_s8, %s572_s8 }
  0x1c   :  { %p579_p0 = por %p578_p13, %p577_p12 }
  0x1e   :  { %p580_p1 = pnand %p579_p0, %p573_p11 }
  0x20   :  { %583 = shalt.err (!%p580_p1)
}
  0x21   :  { %35 = dma.hbm_to_vmem [thread:$0]  %s792_s2, 256, %s30_s27, [#allocation5], %s589_s22, %s589_s22, %s590_s23  }
  0x22   :  { %584 = dma.done.wait [#allocation3], 256  }
  0x23   :  { %585 = vsyncadd [#allocation3], 4294967040 }
  0x24   :  { %586 = dma.done.wait [#allocation5], 256  }
  0x25   :  { %587 = vsyncadd [#allocation5], 4294967040  ;;  %v45_v0 = vlaneseq  ;;  %v592_v1 = vmov 0   ;;  %v43_v6 = vld [vmem:[%s790_s0] sm:$0x7]  ;;  %v536_v14 = vld [vmem:[#allocation4] sm:$0xff]  }
  0x26   :  { %230 = vmatprep.mubr.bf16.mxu0 %v592_v1  ;;  %v44_v10 = vrot.slane %v43_v6, 2  ;;  %526 = vmatprep.mubr.bf16.mxu1 %v536_v14  ;;  %v593_v16 = vmov 1.0|1.0   ;;  %v537_v31 = vld [vmem:[#allocation4 + $0x8] sm:$0xff]   ;;  %v538_v32 = vld [vmem:[#allocation2] sm:$0xff]   ;;  %v539_v33 = vld [vmem:[#allocation2 + $0x8] sm:$0xff]  }
  0x27   :  { %v639_v2 = vshrl.u32 %v45_v0, 7 }
  0x29   :  { %v253_v3 = vsub.s32 1, %v639_v2  ;;  %v64_v4 = vsub.s32 0, %v639_v2  ;;  %v47_v5 = vadd.s32 8, %v639_v2  ;;  %v48_v7 = vadd.s32 16, %v639_v2 }
  0x2a   :  { %v49_v8 = vadd.s32 24, %v639_v2  ;;  %v50_v12 = vadd.s32 32, %v639_v2  ;;  %v51_v13 = vadd.s32 40, %v639_v2  ;;  %v52_v17 = vadd.s32 48, %v639_v2 }
  0x2b   :  { %v649_v9 = vrot.slane %v43_v6, %v253_v3  ;;  %v651_v11 = vrot.slane %v43_v6, %v64_v4  ;;  %v658_v15 = vrot.slane %v44_v10, %v64_v4  ;;  %v53_v18 = vadd.s32 56, %v639_v2 }
  0x2c   :  { %v54_v19 = vadd.s32 64, %v639_v2  ;;  %v55_v20 = vadd.s32 72, %v639_v2  ;;  %v56_v22 = vadd.s32 80, %v639_v2  ;;  %v57_v23 = vadd.s32 88, %v639_v2 }
  0x2d   :  { %vm255_vm0 = vcmp.eq.s32.totalorder %v639_v2, %v649_v9  ;;  %vm256_vm1 = vcmp.eq.s32.totalorder %v47_v5, %v649_v9  ;;  %vm70_vm2 = vcmp.eq.s32.totalorder %v639_v2, %v651_v11  ;;  %vm72_vm4 = vcmp.eq.s32.totalorder %v47_v5, %v651_v11 }
  0x2e   :  { %vm484_vm3 = vmpackc.low %vm256_vm1, %vm255_vm0  ;;  %vm257_vm5 = vcmp.eq.s32.totalorder %v48_v7, %v649_v9  ;;  %vm258_vm6 = vcmp.eq.s32.totalorder %v49_v8, %v649_v9  ;;  %vm71_vm7 = vcmp.eq.s32.totalorder %v639_v2, %v658_v15  ;;  %vm73_vm8 = vcmp.eq.s32.totalorder %v47_v5, %v658_v15 }
  0x2f   :  { %510 = vmatprep.subr.msk.bf16.mxu1 %vm484_vm3, %v593_v16  ;;  %vm436_vm9 = vmpackc.low %vm72_vm4, %vm70_vm2  ;;  %vm75_vm10 = vcmp.eq.s32.totalorder %v48_v7, %v658_v15  ;;  %vm77_vm11 = vcmp.eq.s32.totalorder %v49_v8, %v658_v15  ;;  %vm74_vm13 = vcmp.eq.s32.totalorder %v48_v7, %v651_v11  ;;  %vm76_vm14 = vcmp.eq.s32.totalorder %v49_v8, %v651_v11 }
  0x30   :  { %vm434_vm12 = vmpackc.low %vm73_vm8, %vm71_vm7  ;;  %511 = vmatpush3.bf16.msk.msra.mxu1 %vm484_vm3, %v593_v16  ;;  %vm259_vm0 = vcmp.eq.s32.totalorder %v50_v12, %v649_v9  ;;  %vm260_vm1 = vcmp.eq.s32.totalorder %v51_v13, %v649_v9  ;;  %vm79_vm3 = vcmp.eq.s32.totalorder %v50_v12, %v658_v15  ;;  %vm81_vm4 = vcmp.eq.s32.totalorder %v51_v13, %v658_v15 }
  0x31   :  { %435 = vmatprep.subr.msk.bf16.mxu0 %vm434_vm12, %v593_v16  ;;  %vm486_vm15 = vmpackc.low %vm258_vm6, %vm257_vm5  ;;  %vm78_vm8 = vcmp.eq.s32.totalorder %v50_v12, %v651_v11  ;;  %vm80_vm5 = vcmp.eq.s32.totalorder %v51_v13, %v651_v11  ;;  %vm83_vm12 = vcmp.eq.s32.totalorder %v52_v17, %v658_v15  ;;  %v58_v25 = vadd.s32 96, %v639_v2 }
  0x32   :  { %437 = vmatpush1.bf16.msk.msra.mxu0 %vm436_vm9, %v593_v16  ;;  %512 = vmatprep.subr.msk.bf16.mxu1 %vm486_vm15, %v593_v16  ;;  %vm438_vm2 = vmpackc.low %vm77_vm11, %vm75_vm10  ;;  %vm261_vm9 = vcmp.eq.s32.totalorder %v52_v17, %v649_v9  ;;  %vm262_vm10 = vcmp.eq.s32.totalorder %v53_v18, %v649_v9  ;;  %v59_v26 = vadd.s32 104, %v639_v2  ;;  %v60_v28 = vadd.s32 112, %v639_v2 }
  0x33   :  { %439 = vmatprep.subr.msk.bf16.mxu0 %vm438_vm2, %v593_v16  ;;  %vm440_vm7 = vmpackc.low %vm76_vm14, %vm74_vm13  ;;  %vm85_vm13 = vcmp.eq.s32.totalorder %v53_v18, %v658_v15  ;;  %v61_v29 = vadd.s32 120, %v639_v2 }
  0x34   :  { %513 = vmatpush3.bf16.msk.msra.mxu1 %vm486_vm15, %v593_v16  ;;  %vm488_vm6 = vmpackc.low %vm260_vm1, %vm259_vm0  ;;  %vm263_vm15 = vcmp.eq.s32.totalorder %v54_v19, %v649_v9  ;;  %vm264_vm0 = vcmp.eq.s32.totalorder %v55_v20, %v649_v9 }
  0x35   :  { %514 = vmatprep.subr.msk.bf16.mxu1 %vm488_vm6, %v593_v16  ;;  %vm442_vm11 = vmpackc.low %vm81_vm4, %vm79_vm3  ;;  %vm82_vm3 = vcmp.eq.s32.totalorder %v52_v17, %v651_v11  ;;  %vm84_vm4 = vcmp.eq.s32.totalorder %v53_v18, %v651_v11 }
  0x36   :  { %441 = vmatpush1.bf16.msk.msra.mxu0 %vm440_vm7, %v593_v16  ;;  %vm444_vm14 = vmpackc.low %vm80_vm5, %vm78_vm8  ;;  %vm87_vm7 = vcmp.eq.s32.totalorder %v54_v19, %v658_v15  ;;  %vm89_vm8 = vcmp.eq.s32.totalorder %v55_v20, %v658_v15 }
  0x37   :  { %443 = vmatprep.subr.msk.bf16.mxu0 %vm442_vm11, %v593_v16  ;;  %vm700_vm2 = vmpackc.low %vm262_vm10, %vm261_vm9  ;;  %vm265_vm9 = vcmp.eq.s32.totalorder %v56_v22, %v649_v9  ;;  %vm266_vm10 = vcmp.eq.s32.totalorder %v57_v23, %v649_v9 }
  0x38   :  { %515 = vmatpush3.bf16.msk.msra.mxu1 %vm488_vm6, %v593_v16  ;;  %vm446_vm1 = vmpackc.low %vm85_vm13, %vm83_vm12  ;;  %vm86_vm12 = vcmp.eq.s32.totalorder %v54_v19, %v651_v11  ;;  %vm88_vm13 = vcmp.eq.s32.totalorder %v55_v20, %v651_v11 }
  0x39   :  { %516 = vmatprep.subr.msk.bf16.mxu1 %vm700_vm2, %v593_v16  ;;  %vm717_vm5 = vmpackc.low %vm264_vm0, %vm263_vm15  ;;  %vm93_vm15 = vcmp.eq.s32.totalorder %v57_v23, %v658_v15 }
  0x3a   :  { %445 = vmatpush1.bf16.msk.msra.mxu0 %vm444_vm14, %v593_v16  ;;  %vm448_vm6 = vmpackc.low %vm84_vm4, %vm82_vm3  ;;  %vm91_vm14 = vcmp.eq.s32.totalorder %v56_v22, %v658_v15  ;;  %vm268_vm3 = vcmp.eq.s32.totalorder %v59_v26, %v649_v9 }
  0x3b   :  { %447 = vmatprep.subr.msk.bf16.mxu0 %vm446_vm1, %v593_v16  ;;  %vm450_vm11 = vmpackc.low %vm89_vm8, %vm87_vm7  ;;  %vm267_vm1 = vcmp.eq.s32.totalorder %v58_v25, %v649_v9  ;;  %vm90_vm7 = vcmp.eq.s32.totalorder %v56_v22, %v651_v11  ;;  %vm92_vm8 = vcmp.eq.s32.totalorder %v57_v23, %v651_v11 }
  0x3c   :  { %517 = vmatpush3.bf16.msk.msra.mxu1 %vm700_vm2, %v593_v16  ;;  %vm737_vm0 = vmpackc.low %vm266_vm10, %vm265_vm9  ;;  %vm97_vm9 = vcmp.eq.s32.totalorder %v59_v26, %v658_v15 }
  0x3d   :  { %518 = vmatprep.subr.msk.bf16.mxu1 %vm717_vm5, %v593_v16  ;;  %vm452_vm2 = vmpackc.low %vm88_vm13, %vm86_vm12  ;;  %vm270_vm12 = vcmp.eq.s32.totalorder %v61_v29, %v649_v9 }
  0x3e   :  { %449 = vmatpush1.bf16.msk.msra.mxu0 %vm448_vm6, %v593_v16  ;;  %vm454_vm4 = vmpackc.low %vm93_vm15, %vm91_vm14  ;;  %vm95_vm6 = vcmp.eq.s32.totalorder %v58_v25, %v658_v15  ;;  %vm94_vm14 = vcmp.eq.s32.totalorder %v58_v25, %v651_v11  ;;  %vm96_vm15 = vcmp.eq.s32.totalorder %v59_v26, %v651_v11 }
  0x3f   :  { %451 = vmatprep.subr.msk.bf16.mxu0 %vm450_vm11, %v593_v16  ;;  %vm757_vm10 = vmpackc.low %vm268_vm3, %vm267_vm1  ;;  %vm269_vm11 = vcmp.eq.s32.totalorder %v60_v28, %v649_v9  ;;  %vm101_vm1 = vcmp.eq.s32.totalorder %v61_v29, %v658_v15 }
  0x40   :  { %519 = vmatpush3.bf16.msk.msra.mxu1 %vm717_vm5, %v593_v16  ;;  %vm456_vm5 = vmpackc.low %vm92_vm8, %vm90_vm7  ;;  %vm98_vm7 = vcmp.eq.s32.totalorder %v60_v28, %v651_v11  ;;  %vm100_vm8 = vcmp.eq.s32.totalorder %v61_v29, %v651_v11 }
  0x41   :  { %520 = vmatprep.subr.msk.bf16.mxu1 %vm737_vm0, %v593_v16  ;;  %vm458_vm13 = vmpackc.low %vm97_vm9, %vm95_vm6 }
  0x42   :  { %453 = vmatpush1.bf16.msk.msra.mxu0 %vm452_vm2, %v593_v16  ;;  %vm99_vm2 = vcmp.eq.s32.totalorder %v60_v28, %v658_v15  ;;  %vm498_vm3 = vmpackc.low %vm270_vm12, %vm269_vm11 }
  0x43   :  { %455 = vmatprep.subr.msk.bf16.mxu0 %vm454_vm4, %v593_v16  ;;  %vm460_vm4 = vmpackc.low %vm96_vm15, %vm94_vm14 }
  0x44   :  { %521 = vmatpush3.bf16.msk.msra.mxu1 %vm737_vm0, %v593_v16  ;;  %vm462_vm0 = vmpackc.low %vm101_vm1, %vm99_vm2 }
  0x45   :  { %522 = vmatprep.subr.msk.bf16.mxu1 %vm757_vm10, %v593_v16  ;;  %vm464_vm6 = vmpackc.low %vm100_vm8, %vm98_vm7 }
  0x46   :  { %457 = vmatpush1.bf16.msk.msra.mxu0 %vm456_vm5, %v593_v16 }
  0x47   :  { %459 = vmatprep.subr.msk.bf16.mxu0 %vm458_vm13, %v593_v16 }
  0x48   :  { %523 = vmatpush3.bf16.msk.msra.mxu1 %vm757_vm10, %v593_v16 }
  0x49   :  { %524 = vmatprep.subr.msk.bf16.mxu1 %vm498_vm3, %v593_v16 }
  0x4a   :  { %461 = vmatpush1.bf16.msk.msra.mxu0 %vm460_vm4, %v593_v16 }
  0x4b   :  { %463 = vmatprep.subr.msk.bf16.mxu0 %vm462_vm0, %v593_v16 }
  0x4c   :  { %525 = vmatpush3.bf16.msk.msra.mxu1 %vm498_vm3, %v593_v16 }
  0x4e   :  { %465 = vmatpush1.bf16.msk.msra.mxu0 %vm464_vm6, %v593_v16 }
  0x4f   :  { %527 = vmatmul.mubr.bf16.vlgmr.msra.gmra.mrb[0].mxu1 %v537_v31 }
  0x51   :  { %231 = vmatmul.mubr.bf16.vlgmr.msra.gmra.mrb[0].mxu0 %v538_v32 }
  0x52   :  { %240 = vmatprep.mubr.bf16.mxu0 %v592_v1 }
  0x59   :  { %241 = vmatmul.mubr.bf16.gmra.mrb[4].mxu0 %v539_v33 }
 0x122   :  { %v528_v34 = vpop.f32.mrb[0].mxu1 }
 0x123   :  { %v361_v35 = vpop.f32.mrb[1].mxu1 }
 0x124   :  { %v232_v36 = vpop.f32.mrb[0].mxu0  ;;  %v529_v37 = vpop.f32.mrb[2].mxu1 }
 0x125   :  { %v376_v38 = vmul.f32 %v361_v35, %v232_v36  ;;  %v234_v39 = vpop.f32.mrb[1].mxu0  ;;  %v364_v40 = vpop.f32.mrb[3].mxu1 }
 0x126   :  { %v236_v41 = vpop.f32.mrb[2].mxu0 }
 0x127   :  { %v380_v42 = vmul.f32 %v376_v38, %v234_v39  ;;  %v377_v43 = vmul.f32 %v364_v40, %v236_v41  ;;  %v238_v44 = vpop.f32.mrb[3].mxu0 }
 0x129   :  { %v381_v45 = vmul.f32 %v377_v43, %v238_v44 }
 0x12b   :  { %v384_v46 = vadd.f32 %v381_v45, %v380_v42 }
 0x12c   :  { %v242_v47 = vpop.f32.mrb[4].mxu0 }
 0x12d   :  { %v378_v48 = vmul.f32 %v528_v34, %v242_v47  ;;  %v244_v49 = vpop.f32.mrb[5].mxu0 }
 0x12e   :  { %v246_v50 = vpop.f32.mrb[6].mxu0 }
 0x12f   :  { %v382_v51 = vmul.f32 %v378_v48, %v244_v49  ;;  %v379_v52 = vmul.f32 %v529_v37, %v246_v50  ;;  %v248_v53 = vpop.f32.mrb[7].mxu0 }
 0x131   :  { %v385_v54 = vadd.f32 %v384_v46, %v382_v51  ;;  %v383_v55 = vmul.f32 %v379_v52, %v248_v53 }
 0x133   :  { %v386_v56 = vadd.f32 %v385_v54, %v383_v55 }
 0x135   :  { %v387_v57 = vrot.slane %v386_v56, 4 }
 0x137   :  { %v388_v58 = vadd.f32 %v387_v57, %v386_v56 }
 0x139   :  { %v389_v59 = vrot.slane %v388_v58, 2 }
 0x13b   :  { %v390_v60 = vadd.f32 %v389_v59, %v388_v58 }
 0x13d   :  { %v391_v61 = vrot.slane %v390_v60, 1 }
 0x13f   :  { %v392_v62 = vadd.f32 %v391_v61, %v390_v60 }
 0x141   :  { %393 = vst [vmem:[%s793_s3] sm:$0x1] %v392_v62 }
 0x142   :  { %398 = vsyncpa [#allocation3], 1 }
 0x143   :  { %399 = vsyncpa [#allocation5], 1 }

</bundles_post_ra>
